<compile_context>
chip_gen: v6e
topology: v6e:2x2x1
jax: 0.10.0
libtpu: 0.0.40
codegen_flags: <defaults>
</compile_context>

<pallas_src>
import math

import jax
import jax.numpy as jnp
from jax.experimental import pallas as pl
from jax.experimental.pallas import tpu as pltpu


def _lora_conv1d_kernel(x_ref, w_ref, b_ref, lb_ref, la_ref, o_ref, xb_ref):
    j = pl.program_id(1)

    # LoRA down-projection is independent of the nf tile: compute it once per
    # row block and reuse the VMEM scratch for every output-column tile.
    @pl.when(j == 0)
    def _():
        xb_ref[...] = jnp.dot(x_ref[...], lb_ref[...],
                              preferred_element_type=jnp.float32)

    base = jnp.dot(x_ref[...], w_ref[...],
                   preferred_element_type=jnp.float32)          # (tm, tn)
    lora = jnp.dot(xb_ref[...].astype(la_ref.dtype), la_ref[...],
                   preferred_element_type=jnp.float32)          # (tm, tn)
    o_ref[...] = (base + b_ref[...] + lora).astype(o_ref.dtype)


def _round_up(n, m):
    return ((n + m - 1) // m) * m


def lora_conv1d_forward(x, weight, bias, lora_B=None, lora_A=None, *,
                        tm=256, tn=512, compute_dtype=None,
                        vmem_limit_bytes=48 * 1024 * 1024):
    """x: (..., nx) -> (..., nf).  All matmuls / bias add run in the Pallas kernel.

    compute_dtype: optionally cast MXU operands (x, W, lora_A/B) to e.g.
    jnp.bfloat16 (recommended on v6e/v7x); accumulation stays f32.
    """
    *lead, nx = x.shape
    nf = weight.shape[1]
    M = math.prod(lead) if lead else 1
    out_dtype = x.dtype

    # rank == 0 path of the module (plain Conv1D): use zero adapters of rank 1.
    if lora_A is None or lora_B is None or lora_A.shape[0] == 0:
        lora_B = jnp.zeros((nx, 1), weight.dtype)
        lora_A = jnp.zeros((1, nf), weight.dtype)
    rank = lora_A.shape[0]

    # Row tile: big enough to feed the MXU / amortize per-grid-step overhead,
    # never larger than the (16-aligned) problem; 16 keeps bf16 packing happy.
    tm_eff = max(16, min(_round_up(tm, 16), _round_up(M, 16)))
    # Column tile: lane-dense multiple of 128, bounded by the padded layer width.
    tn_eff = max(128, min(_round_up(tn, 128), _round_up(nf, 128)))

    M_pad = _round_up(M, tm_eff)
    nf_pad = _round_up(nf, tn_eff)

    x2d = x.reshape(M, nx)
    w2d = weight
    b2d = bias.reshape(1, nf)
    la2d = lora_A
    lb2d = lora_B

    if M_pad != M:
        x2d = jnp.pad(x2d, ((0, M_pad - M), (0, 0)))
    if nf_pad != nf:
        w2d = jnp.pad(w2d, ((0, 0), (0, nf_pad - nf)))
        b2d = jnp.pad(b2d, ((0, 0), (0, nf_pad - nf)))
        la2d = jnp.pad(la2d, ((0, 0), (0, nf_pad - nf)))

    if compute_dtype is not None:
        x2d = x2d.astype(compute_dtype)
        w2d = w2d.astype(compute_dtype)
        lb2d = lb2d.astype(compute_dtype)
        la2d = la2d.astype(compute_dtype)
    b2d = b2d.astype(jnp.float32)   # bias added in f32 accumulator space

    grid = (M_pad // tm_eff, nf_pad // tn_eff)

    out2d = pl.pallas_call(
        _lora_conv1d_kernel,
        out_shape=jax.ShapeDtypeStruct((M_pad, nf_pad), out_dtype),
        grid_spec=pltpu.PrefetchScalarGridSpec(
            num_scalar_prefetch=0,
            grid=grid,
            in_specs=[
                pl.BlockSpec((tm_eff, nx), lambda i, j: (i, 0)),    # x row tile
                pl.BlockSpec((nx, tn_eff), lambda i, j: (0, j)),    # W column tile
                pl.BlockSpec((1, tn_eff), lambda i, j: (0, j)),     # bias tile
                pl.BlockSpec((nx, rank), lambda i, j: (0, 0)),      # lora_B (whole, tiny)
                pl.BlockSpec((rank, tn_eff), lambda i, j: (0, j)),  # lora_A column tile
            ],
            out_specs=pl.BlockSpec((tm_eff, tn_eff), lambda i, j: (i, j)),
            scratch_shapes=[pltpu.VMEM((tm_eff, rank), jnp.float32)],  # x @ lora_B
        ),
        compiler_params=pltpu.CompilerParams(
            dimension_semantics=("parallel", "arbitrary"),
            vmem_limit_bytes=vmem_limit_bytes,
        ),
    )(x2d, w2d, b2d, lb2d, la2d)

    out = out2d[:M, :nf]
    return out.reshape(*lead, nf)


def init_params(key, nx, nf, rank, dtype=jnp.float32):
    """Deterministic init mirroring the module's reset_parameters.

    Conv1D: weight ~ N(0, 0.02), bias = 0.
    lora_A: kaiming_uniform_(a=sqrt(5)) on (rank, nf) -> fan_in = nf.
    lora_B: zeros at init; we use small random values so the LoRA path is
    numerically exercised by the test.
    """
    kw, ka, kb = jax.random.split(key, 3)
    weight = (0.02 * jax.random.normal(kw, (nx, nf))).astype(dtype)
    bias = jnp.zeros((nf,), dtype)
    gain = math.sqrt(2.0 / (1.0 + 5.0))
    bound = gain * math.sqrt(3.0 / nf)
    lora_A = jax.random.uniform(ka, (rank, nf), minval=-bound, maxval=bound).astype(dtype)
    lora_B = (0.01 * jax.random.normal(kb, (nx, rank))).astype(dtype)
    return weight, bias, lora_B, lora_A


if __name__ == "__main__":
    key = jax.random.PRNGKey(0)

    def ref_forward(x, w, b, lb, la):
        return x @ w + b + (x @ lb) @ la

    # Case 1: small GPT-2-style shapes.
    batch, seq, nx, nf, rank = 2, 8, 32, 32, 4
    kx, kp, key = jax.random.split(key, 3)
    x = jax.random.normal(kx, (batch, seq, nx), dtype=jnp.float32)
    weight, bias, lora_B, lora_A = init_params(kp, nx, nf, rank)
    y = jax.block_until_ready(lora_conv1d_forward(x, weight, bias, lora_B, lora_A))
    y_ref = ref_forward(x, weight, bias, lora_B, lora_A)
    assert y.shape == (batch, seq, nf)
    assert jnp.allclose(y, y_ref, atol=1e-5, rtol=1e-5)

    # Case 2: ragged shapes that exercise the row/column padding path.
    batch, seq, nx, nf, rank = 3, 5, 48, 80, 4
    kx, kp = jax.random.split(key)
    x = jax.random.normal(kx, (batch, seq, nx), dtype=jnp.float32)
    weight, bias, lora_B, lora_A = init_params(kp, nx, nf, rank)
    y = jax.block_until_ready(lora_conv1d_forward(x, weight, bias, lora_B, lora_A))
    y_ref = ref_forward(x, weight, bias, lora_B, lora_A)
    assert y.shape == (batch, seq, nf)
    assert jnp.allclose(y, y_ref, atol=1e-5, rtol=1e-5)

    print("KERNEL_OK")
</pallas_src>

<mosaic_0001>
module attributes {stable_mosaic.version = 11 : i64} {
  func.func @_lora_conv1d_kernel(%arg0: i32, %arg1: i32, %arg2: memref<16x32xf32, #tpu.memory_space<vmem>>, %arg3: memref<32x128xf32, #tpu.memory_space<vmem>>, %arg4: memref<1x128xf32, #tpu.memory_space<vmem>>, %arg5: memref<32x4xf32, #tpu.memory_space<vmem>>, %arg6: memref<4x128xf32, #tpu.memory_space<vmem>>, %arg7: memref<16x128xf32, #tpu.memory_space<vmem>>, %arg8: memref<16x4xf32, #tpu.memory_space<vmem>>) attributes {dimension_semantics = [#tpu.dimension_semantics<parallel>, #tpu.dimension_semantics<arbitrary>], iteration_bounds = array<i64: 1, 1>, scalar_prefetch = 0 : i64, scratch_operands = 1 : i64, tpu.core_type = #tpu.core_type<tc>, window_params = [{transform_indices = @transform_0, window_bounds = array<i64: 16, 32>}, {transform_indices = @transform_1, window_bounds = array<i64: 32, 128>}, {transform_indices = @transform_2, window_bounds = array<i64: 1, 128>}, {pipeline_mode = #tpu.pipeline_mode<synchronous>, transform_indices = @transform_3, window_bounds = array<i64: 32, 4>}, {transform_indices = @transform_4, window_bounds = array<i64: 4, 128>}, {transform_indices = @transform_5, window_bounds = array<i64: 16, 128>}]} {
    %c0_i32 = arith.constant 0 : i32
    %0 = arith.cmpi eq, %arg1, %c0_i32 : i32
    %1 = arith.extui %0 : i1 to i32
    %c0_i32_0 = arith.constant 0 : i32
    %2 = arith.cmpi ne, %1, %c0_i32_0 : i32
    scf.if %2 {
      %c0_13 = arith.constant 0 : index
      %c0_14 = arith.constant 0 : index
      %14 = vector.load %arg2[%c0_13, %c0_14] : memref<16x32xf32, #tpu.memory_space<vmem>>, vector<16x32xf32>
      %c0_15 = arith.constant 0 : index
      %c0_16 = arith.constant 0 : index
      %15 = vector.load %arg5[%c0_15, %c0_16] : memref<32x4xf32, #tpu.memory_space<vmem>>, vector<32x4xf32>
      %cst_17 = arith.constant dense<0.000000e+00> : vector<16x4xf32>
      %16 = tpu.matmul %14, %15, %cst_17 {dimension_numbers = #tpu.dot_dimension_numbers<[1], [0], [0], [1], [0, 0, 1, 1], [], []>} : vector<16x32xf32>, vector<32x4xf32>, vector<16x4xf32> -> vector<16x4xf32>
      %c0_18 = arith.constant 0 : index
      %c0_19 = arith.constant 0 : index
      %17 = vector.load %arg8[%c0_18, %c0_19] : memref<16x4xf32, #tpu.memory_space<vmem>>, vector<16x4xf32>
      tpu.vector_store %arg8[%c0_18, %c0_19], %16 {strides = array<i32>} : memref<16x4xf32, #tpu.memory_space<vmem>>, vector<16x4xf32>,
    } else {
    }
    %c0 = arith.constant 0 : index
    %c0_1 = arith.constant 0 : index
    %3 = vector.load %arg2[%c0, %c0_1] : memref<16x32xf32, #tpu.memory_space<vmem>>, vector<16x32xf32>
    %c0_2 = arith.constant 0 : index
    %c0_3 = arith.constant 0 : index
    %4 = vector.load %arg3[%c0_2, %c0_3] : memref<32x128xf32, #tpu.memory_space<vmem>>, vector<32x128xf32>
    %cst = arith.constant dense<0.000000e+00> : vector<16x128xf32>
    %5 = tpu.matmul %3, %4, %cst {dimension_numbers = #tpu.dot_dimension_numbers<[1], [0], [0], [1], [0, 0, 1, 1], [], []>} : vector<16x32xf32>, vector<32x128xf32>, vector<16x128xf32> -> vector<16x128xf32>
    %c0_4 = arith.constant 0 : index
    %c0_5 = arith.constant 0 : index
    %6 = vector.load %arg8[%c0_4, %c0_5] : memref<16x4xf32, #tpu.memory_space<vmem>>, vector<16x4xf32>
    %c0_6 = arith.constant 0 : index
    %c0_7 = arith.constant 0 : index
    %7 = vector.load %arg6[%c0_6, %c0_7] : memref<4x128xf32, #tpu.memory_space<vmem>>, vector<4x128xf32>
    %cst_8 = arith.constant dense<0.000000e+00> : vector<16x128xf32>
    %8 = tpu.matmul %6, %7, %cst_8 {dimension_numbers = #tpu.dot_dimension_numbers<[1], [0], [0], [1], [0, 0, 1, 1], [], []>} : vector<16x4xf32>, vector<4x128xf32>, vector<16x128xf32> -> vector<16x128xf32>
    %c0_9 = arith.constant 0 : index
    %c0_10 = arith.constant 0 : index
    %9 = vector.load %arg4[%c0_9, %c0_10] : memref<1x128xf32, #tpu.memory_space<vmem>>, vector<1x128xf32>
    %10 = vector.broadcast %9 : vector<1x128xf32> to vector<16x128xf32>
    %11 = arith.addf %5, %10 : vector<16x128xf32>
    %12 = arith.addf %11, %8 : vector<16x128xf32>
    %c0_11 = arith.constant 0 : index
    %c0_12 = arith.constant 0 : index
    %13 = vector.load %arg7[%c0_11, %c0_12] : memref<16x128xf32, #tpu.memory_space<vmem>>, vector<16x128xf32>
    tpu.vector_store %arg7[%c0_11, %c0_12], %12 {strides = array<i32>} : memref<16x128xf32, #tpu.memory_space<vmem>>, vector<16x128xf32>,
    return
  }
  func.func @transform_0(%arg0: i32, %arg1: i32) -> (i32, i32) {
    %c0_i32 = arith.constant 0 : i32
    %c0_i32_0 = arith.constant 0 : i32
    return %arg0, %c0_i32 : i32, i32
  }
  func.func @transform_1(%arg0: i32, %arg1: i32) -> (i32, i32) {
    %c0_i32 = arith.constant 0 : i32
    %c0_i32_0 = arith.constant 0 : i32
    return %c0_i32, %arg1 : i32, i32
  }
  func.func @transform_2(%arg0: i32, %arg1: i32) -> (i32, i32) {
    %c0_i32 = arith.constant 0 : i32
    %c0_i32_0 = arith.constant 0 : i32
    return %c0_i32, %arg1 : i32, i32
  }
  func.func @transform_3(%arg0: i32, %arg1: i32) -> (i32, i32) {
    %c0_i32 = arith.constant 0 : i32
    %c0_i32_0 = arith.constant 0 : i32
    %c0_i32_1 = arith.constant 0 : i32
    return %c0_i32, %c0_i32_0 : i32, i32
  }
  func.func @transform_4(%arg0: i32, %arg1: i32) -> (i32, i32) {
    %c0_i32 = arith.constant 0 : i32
    %c0_i32_0 = arith.constant 0 : i32
    return %c0_i32, %arg1 : i32, i32
  }
  func.func @transform_5(%arg0: i32, %arg1: i32) -> (i32, i32) {
    %c0_i32 = arith.constant 0 : i32
    return %arg0, %arg1 : i32, i32
  }
}

</mosaic_0001>

<bundles_post_ra>
// kernel: tpu_custom_call.1
= control target key start
LH: loop header
LB: loop body
LE: loop exit
PB: predicated region body
PF: predicated region fallthrough
CT: control target
= control target key end

     0   :  { %10 = vsyncpa [#allocation4], 0  ;;  %s513_s0 = inlined_call_operand.hbm [shape: f32[16,32], index: 0, kind: input, shape index: {}]   ;;  %s514_s1 = inlined_call_operand.vmem [shape: f32[32,128], index: 1, kind: input, shape index: {}]   ;;  %s515_s2 = inlined_call_operand.vmem [shape: f32[1,128], index: 2, kind: input, shape index: {}]   ;;  %s516_s3 = inlined_call_operand.vmem [shape: f32[32,4], index: 3, kind: input, shape index: {}]   ;;  %s517_s4 = inlined_call_operand.vmem [shape: f32[4,128], index: 4, kind: input, shape index: {}]   ;;  %s518_s5 = inlined_call_operand.hbm [shape: f32[16,128], index: 5, kind: output, shape index: {}]  }
   0x1   :  { %11 = vsyncpa [#allocation5], 0  ;;  %s433_s18 = smov [#allocation3]  }
   0x2   :  { %s17_s19 = sshll.u32 %s433_s18, 4  ;;  %s18_s19 = int_to_ptr.vmem [resolvable:$true] %s17_s19 }
   0x3   :  { %s397_s20 = scalar_lea.vmem %s18_s19, 256  ;;  %p402_p1 = scmp.lt.s32.totalorder %s18_s19, %s18_s19 }
   0x4   :  { %p398_p0 = scmp.ne.s32.totalorder %s18_s19, %s397_s20  ;;  %p403_p2 = scmp.lt.s32.totalorder %s397_s20, %s397_s20 }
   0x6   :  { %p404_p3 = por %p403_p2, %p402_p1 }
   0x8   :  { %p405_p4 = pnand %p404_p3, %p398_p0 }
   0xa   :  { %408 = shalt.err (!%p405_p4)
}
   0xb   :  { %s434_s21 = smov 128   ;;  %s435_s22 = smov 8  }
   0xc   :  { %23 = dma.hbm_to_vmem [thread:$0]  %s513_s0, 256, %s18_s19, [#allocation4], %s434_s21, %s434_s21, %s435_s22  }
   0xd   :  { %429 = dma.done.wait [#allocation4], 256  }
   0xe   :  { %430 = vsyncadd [#allocation4], 4294967040  ;;  %vm45_vm0 = vcmask 261120   ;;  %v44_v0 = vld [vmem:[%s516_s3 + $0x18] sm:$0xff]  ;;  %v43_v1 = vld [vmem:[%s516_s3 + $0x10] sm:$0xff]  ;;  %vm146_vm1 = vcmask 1043456  }
   0xf   :  { %358 = vmatprep.subr.mxu0 %v44_v0  ;;  %v39_v2 = vld [vmem:[#allocation3] sm:$0xff]  ;;  %v42_v3 = vld [vmem:[%s516_s3 + $0x8] sm:$0xff]  ;;  %v41_v4 = vld [vmem:[%s516_s3] sm:$0xff]  ;;  %vm127_vm2 = vcmask 31744   ;;  %s436_s17 = smov [#allocation6]  }
  0x10   :  { %359 = vmatpush3.msra.mxu0 %v44_v0  ;;  %366 = vmatprep.mubr.msk.f32.mxu0 %vm45_vm0, %v39_v2  ;;  %v40_v5 = vld [vmem:[#allocation3 + $0x8] sm:$0xff]  ;;  %v138_v6 = vld [vmem:[%s517_s4] sm:$0xf]  ;;  %v134_v12 = vld [vmem:[%s514_s1 + $0x10] sm:$0xff]  ;;  %s323_s18 = sshll.u32 %s436_s17, 4  ;;  %s324_s18 = int_to_ptr.vmem [resolvable:$true] %s323_s18 }
  0x11   :  { %360 = vmatprep.subr.mxu0 %v43_v1  ;;  %369 = vmatprep.subr.msk.mxu1 %vm146_vm1, %v138_v6  ;;  %v135_v7 = vld [vmem:[%s514_s1 + $0x18] sm:$0xff]  ;;  %v133_v13 = vld [vmem:[%s514_s1 + $0x8] sm:$0xff]  ;;  %v132_v14 = vld [vmem:[%s514_s1] sm:$0xff]  ;;  %s409_s1 = scalar_lea.vmem %s324_s18, 256  ;;  %p414_p6 = scmp.lt.s32.totalorder %s324_s18, %s324_s18 }
  0x12   :  { %361 = vmatpush3.msra.mxu0 %v43_v1  ;;  %370 = vmatpush3.msk.msra.mxu1 %vm146_vm1, %v138_v6  ;;  %v340_v17 = vld [vmem:[%s515_s2] ss:$0 sm:$0xff]  ;;  %p410_p5 = scmp.ne.s32.totalorder %s324_s18, %s409_s1  ;;  %p415_p7 = scmp.lt.s32.totalorder %s409_s1, %s409_s1 }
  0x13   :  { %362 = vmatprep.subr.mxu0 %v42_v3  ;;  %374 = vmatprep.subr.mxu1 %v135_v7 }
  0x14   :  { %363 = vmatpush3.msra.mxu0 %v42_v3  ;;  %p416_p8 = por %p415_p7, %p414_p6 }
  0x15   :  { %364 = vmatprep.subr.mxu0 %v41_v4 }
  0x16   :  { %365 = vmatpush3.msra.mxu0 %v41_v4  ;;  %p417_p9 = pnand %p416_p8, %p410_p5 }
  0x17   :  { %367 = vmatmul.mubr.msk.f32.vlgmr.msra.gmra.mxu0 %vm45_vm0, %v40_v5 }
  0xd7   :  { %v368_v8 = vpop.f32.mrf.mxu0 }
  0xd8   :  { %129 = vst.msk [vmem:[#allocation2 + $0x8] sm:$0xff] %vm127_vm2, %v368_v8 }
  0xd9   :  { %v118_v9 = vpop.f32.mrf.mxu0 }
  0xda   :  { %128 = vst.msk [vmem:[#allocation2] sm:$0xff] %vm127_vm2, %v118_v9 }
  0xdf   :  { %v137_v11 = vld [vmem:[#allocation2 + $0x8] sm:$0xff] }
  0xe1   :  { %v136_v10 = vld [vmem:[#allocation2] sm:$0xff] }
  0xe2   :  { %371 = vmatprep.mubr.msk.f32.mxu1 %vm127_vm2, %v136_v10 }
  0xe3   :  { %372 = vmatmul.mubr.msk.f32.vlgmr.msra.gmra.mxu1 %vm127_vm2, %v137_v11 }
  0xe4   :  { %375 = vmatpush3.msra.mxu1 %v135_v7  ;;  %382 = vmatprep.mubr.msk.f32.mxu1 %vm45_vm0, %v39_v2 }
  0xe5   :  { %376 = vmatprep.subr.mxu1 %v134_v12 }
  0xe6   :  { %377 = vmatpush3.msra.mxu1 %v134_v12 }
  0xe7   :  { %378 = vmatprep.subr.mxu1 %v133_v13 }
  0xe8   :  { %379 = vmatpush3.msra.mxu1 %v133_v13 }
  0xe9   :  { %380 = vmatprep.subr.mxu1 %v132_v14 }
  0xea   :  { %381 = vmatpush3.msra.mxu1 %v132_v14 }
  0xeb   :  { %383 = vmatmul.mubr.msk.f32.vlgmr.msra.gmra.mxu1 %vm45_vm0, %v40_v5 }
 0x1a3   :  { %v373_v15 = vpop.f32.mrf.mxu1 }
 0x1a5   :  { %v216_v16 = vpop.f32.mrf.mxu1 }
 0x1ab   :  { %v384_v18 = vpop.f32.mrf.mxu1 }
 0x1ac   :  { %v311_v19 = vadd.f32 %v384_v18, %v340_v17 }
 0x1ad   :  { %v305_v20 = vpop.f32.mrf.mxu1 }
 0x1ae   :  { %v315_v21 = vadd.f32 %v373_v15, %v311_v19  ;;  %v306_v22 = vadd.f32 %v340_v17, %v305_v20 }
 0x1b0   :  { %317 = vst [vmem:[#allocation6 + $0x8] sm:$0xff] %v315_v21  ;;  %v314_v23 = vadd.f32 %v306_v22, %v216_v16 }
 0x1b2   :  { %316 = vst [vmem:[#allocation6] sm:$0xff] %v314_v23 }
 0x1b3   :  { %420 = shalt.err (!%p417_p9)
}
 0x1b4   :  { %329 = dma.vmem_to_hbm [thread:$0]  %s324_s18, 256, %s518_s5, [#allocation5], %s434_s21, %s434_s21, %s435_s22  }
 0x1b5   :  { %431 = dma.done.wait [#allocation5], 256  }
 0x1b6   :  { %432 = vsyncadd [#allocation5], 4294967040 }
 0x1b7   :  { %333 = vsyncpa [#allocation4], 1 }
 0x1b8   :  { %334 = vsyncpa [#allocation5], 1 }

</bundles_post_ra>
